<compile_context>
chip_gen: v5e
topology: v5e:2x2
jax: 0.10.0
libtpu: 0.0.40
codegen_flags: <defaults>
</compile_context>

<pallas_src>
import jax
import jax.numpy as jnp
from jax.experimental import pallas as pl
from jax.experimental.pallas import tpu as pltpu


def _gaussian_1d(kernel_size: int, sigma: float) -> jnp.ndarray:
    x = jnp.arange(kernel_size, dtype=jnp.float32)
    mean = (kernel_size - 1) / 2.0
    g = jnp.exp(-((x - mean) ** 2) / (2.0 * sigma ** 2))
    return g / jnp.sum(g)


def _aa_kernel(x_ref, a_ref, b_ref, o_ref):
    """One batch element, all channels fused.

    x_ref: (1, C, H, W)   raw (unpadded) input planes
    a_ref: (C*Ho, C*H)    block-diagonal row blur+subsample (pad folded in)
    b_ref: (W, Wo)        column blur+subsample (pad folded in)
    o_ref: (1, C, Ho, Wo)
    """
    _, C, H, W = x_ref.shape
    Wo = b_ref.shape[1]
    Ho = a_ref.shape[0] // C

    x2 = x_ref[0].reshape(C * H, W)                                      # layout-free merge
    y = jnp.dot(x2, b_ref[...], preferred_element_type=jnp.float32)      # (C*H, Wo)
    out = jnp.dot(a_ref[...], y, preferred_element_type=jnp.float32)     # (C*Ho, Wo)
    o_ref[0] = out.reshape(C, Ho, Wo).astype(o_ref.dtype)


def anti_alias_interpolation2d(x: jnp.ndarray, channels: int, scale: float,
                               compute_dtype=None) -> jnp.ndarray:
    """Matches AntiAliasInterpolation2d(channels, scale).forward(x), x in NCHW."""
    if scale == 1.0:
        return x

    sigma = (1.0 / scale - 1.0) / 2.0
    kernel_size = 2 * round(sigma * 4) + 1
    ka = kernel_size // 2
    kb = ka - 1 if kernel_size % 2 == 0 else ka
    inv = int(1.0 / scale)

    N, C, H, W = x.shape
    assert C == channels
    Hp, Wp = H + ka + kb, W + ka + kb
    Hc, Wc = Hp - kernel_size + 1, Wp - kernel_size + 1      # conv 'valid' output size
    Ho, Wo = -(-Hc // inv), -(-Wc // inv)                    # after ::inv subsample

    g = _gaussian_1d(kernel_size, sigma)

    def make_mat(n_out, n_pad, n_raw):
        # Full (n_out, n_pad) blur+subsample matrix on the *padded* axis, then
        # fold the zero padding by trimming to the unpadded extent: columns
        # outside [ka, ka + n_raw) only ever multiply zeros.
        cols = jnp.arange(n_out)[:, None] * inv + jnp.arange(kernel_size)[None, :]
        m = jnp.zeros((n_out, n_pad), jnp.float32)
        m = m.at[jnp.arange(n_out)[:, None], cols].set(jnp.broadcast_to(g, cols.shape))
        return m[:, ka:ka + n_raw]

    A_eff = make_mat(Ho, Hp, H)            # (Ho, H)
    B_eff = make_mat(Wo, Wp, W).T          # (W, Wo)
    # Block-diagonal row matrix so the H-contraction of all channels is one
    # clean 2-D MXU matmul on the channel-stacked (C*H, Wo) intermediate.
    A_blk = jnp.kron(jnp.eye(C, dtype=jnp.float32), A_eff)   # (C*Ho, C*H)

    cdt = jnp.dtype(compute_dtype) if compute_dtype is not None else x.dtype
    xk = x.astype(cdt)
    A_blk = A_blk.astype(cdt)
    B_eff = B_eff.astype(cdt)

    itemsize = jnp.dtype(cdt).itemsize
    cost = pl.CostEstimate(
        flops=2 * N * (C * H * W * Wo + (C * Ho) * (C * H) * Wo),
        transcendentals=0,
        bytes_accessed=(xk.size + N * C * Ho * Wo + A_blk.size + B_eff.size) * itemsize,
    )

    out = pl.pallas_call(
        _aa_kernel,
        out_shape=jax.ShapeDtypeStruct((N, C, Ho, Wo), x.dtype),
        grid_spec=pltpu.PrefetchScalarGridSpec(
            num_scalar_prefetch=0,
            grid=(N,),
            in_specs=[
                pl.BlockSpec((1, C, H, W), lambda n: (n, 0, 0, 0)),
                pl.BlockSpec((C * Ho, C * H), lambda n: (0, 0)),
                pl.BlockSpec((W, Wo), lambda n: (0, 0)),
            ],
            out_specs=pl.BlockSpec((1, C, Ho, Wo), lambda n: (n, 0, 0, 0)),
        ),
        compiler_params=pltpu.CompilerParams(
            dimension_semantics=("parallel",)),
        cost_estimate=cost,
    )(xk, A_blk, B_eff)
    return out


def _reference(x: jnp.ndarray, channels: int, scale: float) -> jnp.ndarray:
    """Pure-JAX reference mirroring the PyTorch forward literally."""
    if scale == 1.0:
        return x
    sigma = (1.0 / scale - 1.0) / 2.0
    kernel_size = 2 * round(sigma * 4) + 1
    ka = kernel_size // 2
    kb = ka - 1 if kernel_size % 2 == 0 else ka
    inv = int(1.0 / scale)
    C = x.shape[1]
    g = _gaussian_1d(kernel_size, sigma)
    k2d = jnp.outer(g, g)                                    # == PyTorch's normalized kernel
    weight = jnp.broadcast_to(k2d[None, None], (C, 1, kernel_size, kernel_size))
    xp = jnp.pad(x, ((0, 0), (0, 0), (ka, kb), (ka, kb)))
    out = jax.lax.conv_general_dilated(
        xp, weight, window_strides=(1, 1), padding="VALID",
        feature_group_count=C, dimension_numbers=("NCHW", "OIHW", "NCHW"))
    return out[:, :, ::inv, ::inv]


if __name__ == "__main__":
    key = jax.random.PRNGKey(0)
    channels, scale = 3, 0.25
    x = jax.random.uniform(key, (2, channels, 16, 16), dtype=jnp.float32)

    out = anti_alias_interpolation2d(x, channels, scale)
    out = jax.block_until_ready(out)

    ref = jax.block_until_ready(_reference(x, channels, scale))
    assert out.shape == ref.shape == (2, channels, 4, 4), (out.shape, ref.shape)
    assert jnp.allclose(out, ref, atol=1e-5, rtol=1e-5), float(jnp.max(jnp.abs(out - ref)))

    print("KERNEL_OK")
</pallas_src>

<mosaic_0001>
module attributes {stable_mosaic.version = 11 : i64} {
  func.func @_aa_kernel(%arg0: i32, %arg1: memref<1x3x16x16xf32, #tpu.memory_space<vmem>>, %arg2: memref<12x48xf32, #tpu.memory_space<vmem>>, %arg3: memref<16x4xf32, #tpu.memory_space<vmem>>, %arg4: memref<1x3x4x4xf32, #tpu.memory_space<vmem>>) attributes {dimension_semantics = [#tpu.dimension_semantics<parallel>], iteration_bounds = array<i64: 2>, scalar_prefetch = 0 : i64, scratch_operands = 0 : i64, tpu.core_type = #tpu.core_type<tc>, window_params = [{transform_indices = @transform_0, window_bounds = array<i64: 1, 3, 16, 16>}, {pipeline_mode = #tpu.pipeline_mode<synchronous>, transform_indices = @transform_1, window_bounds = array<i64: 12, 48>}, {pipeline_mode = #tpu.pipeline_mode<synchronous>, transform_indices = @transform_2, window_bounds = array<i64: 16, 4>}, {transform_indices = @transform_3, window_bounds = array<i64: 1, 3, 4, 4>}]} {
    %c0 = arith.constant 0 : index
    %c0_0 = arith.constant 0 : index
    %c0_1 = arith.constant 0 : index
    %c0_2 = arith.constant 0 : index
    %0 = vector.load %arg1[%c0, %c0_0, %c0_1, %c0_2] : memref<1x3x16x16xf32, #tpu.memory_space<vmem>>, vector<1x3x16x16xf32>
    %1 = vector.shape_cast %0 : vector<1x3x16x16xf32> to vector<3x16x16xf32>
    %2 = vector.shape_cast %1 : vector<3x16x16xf32> to vector<48x16xf32>
    %c0_3 = arith.constant 0 : index
    %c0_4 = arith.constant 0 : index
    %3 = vector.load %arg3[%c0_3, %c0_4] : memref<16x4xf32, #tpu.memory_space<vmem>>, vector<16x4xf32>
    %cst = arith.constant dense<0.000000e+00> : vector<48x4xf32>
    %4 = tpu.matmul %2, %3, %cst {dimension_numbers = #tpu.dot_dimension_numbers<[1], [0], [0], [1], [0, 0, 1, 1], [], []>} : vector<48x16xf32>, vector<16x4xf32>, vector<48x4xf32> -> vector<48x4xf32>
    %c0_5 = arith.constant 0 : index
    %c0_6 = arith.constant 0 : index
    %5 = vector.load %arg2[%c0_5, %c0_6] : memref<12x48xf32, #tpu.memory_space<vmem>>, vector<12x48xf32>
    %cst_7 = arith.constant dense<0.000000e+00> : vector<12x4xf32>
    %6 = tpu.matmul %5, %4, %cst_7 {dimension_numbers = #tpu.dot_dimension_numbers<[1], [0], [0], [1], [0, 0, 1, 1], [], []>} : vector<12x48xf32>, vector<48x4xf32>, vector<12x4xf32> -> vector<12x4xf32>
    %7 = vector.shape_cast %6 : vector<12x4xf32> to vector<3x4x4xf32>
    %c0_8 = arith.constant 0 : index
    %c0_9 = arith.constant 0 : index
    %c0_10 = arith.constant 0 : index
    %c0_11 = arith.constant 0 : index
    %8 = vector.load %arg4[%c0_8, %c0_9, %c0_10, %c0_11] : memref<1x3x4x4xf32, #tpu.memory_space<vmem>>, vector<1x3x4x4xf32>
    %9 = vector.shape_cast %8 : vector<1x3x4x4xf32> to vector<3x4x4xf32>
    %10 = vector.shape_cast %7 : vector<3x4x4xf32> to vector<1x3x4x4xf32>
    tpu.vector_store %arg4[%c0_8, %c0_9, %c0_10, %c0_11], %10 {strides = array<i32>} : memref<1x3x4x4xf32, #tpu.memory_space<vmem>>, vector<1x3x4x4xf32>,
    return
  }
  func.func @transform_0(%arg0: i32) -> (i32, i32, i32, i32) {
    %c0_i32 = arith.constant 0 : i32
    %c0_i32_0 = arith.constant 0 : i32
    %c0_i32_1 = arith.constant 0 : i32
    %c0_i32_2 = arith.constant 0 : i32
    return %arg0, %c0_i32, %c0_i32_0, %c0_i32_1 : i32, i32, i32, i32
  }
  func.func @transform_1(%arg0: i32) -> (i32, i32) {
    %c0_i32 = arith.constant 0 : i32
    %c0_i32_0 = arith.constant 0 : i32
    %c0_i32_1 = arith.constant 0 : i32
    return %c0_i32, %c0_i32_0 : i32, i32
  }
  func.func @transform_2(%arg0: i32) -> (i32, i32) {
    %c0_i32 = arith.constant 0 : i32
    %c0_i32_0 = arith.constant 0 : i32
    %c0_i32_1 = arith.constant 0 : i32
    return %c0_i32, %c0_i32_0 : i32, i32
  }
  func.func @transform_3(%arg0: i32) -> (i32, i32, i32, i32) {
    %c0_i32 = arith.constant 0 : i32
    %c0_i32_0 = arith.constant 0 : i32
    %c0_i32_1 = arith.constant 0 : i32
    %c0_i32_2 = arith.constant 0 : i32
    return %arg0, %c0_i32, %c0_i32_0, %c0_i32_1 : i32, i32, i32, i32
  }
}

</mosaic_0001>

<bundles_post_ra>
// kernel: tpu_custom_call.1
= control target key start
LH: loop header
LB: loop body
LE: loop exit
PB: predicated region body
PF: predicated region fallthrough
CT: control target
= control target key end

     0   :  { %8 = vsyncpa [#allocation3], 0  ;;  %s714_s0 = inlined_call_operand.hbm [shape: f32[2,3,16,16], index: 0, kind: input, shape index: {}]   ;;  %s715_s1 = inlined_call_operand.vmem [shape: f32[12,48], index: 1, kind: input, shape index: {}]   ;;  %s716_s2 = inlined_call_operand.vmem [shape: f32[16,4], index: 2, kind: input, shape index: {}]   ;;  %s717_s3 = inlined_call_operand.hbm [shape: f32[2,3,4,4], index: 3, kind: output, shape index: {}]  }
   0x1   :  { %10 = vsyncpa [#allocation3 + $0x1], 0 }
   0x2   :  { %11 = vsyncpa [#allocation4], 0 }
   0x3   :  { %13 = vsyncpa [#allocation4 + $0x1], 0  ;;  %s584_s12 = smov 0   ;;  %s586_s13 = smov 0  }
   0x4   :  { %s588_s14 = smov 0   ;;  %s590_s15 = smov 0  }
   0x5 LB: > { %s605_s16 = sadd.s32 4294967295, %s558_s15   ;;  %s381_s17 = sadd.s32 4294967294, %s558_s15   ;;  %s558_s15 = sphi %s590_s15, %s725_s15   ;;  %s554_s14 = sphi %s588_s14, %s724_s14   ;;  %s550_s13 = sphi %s586_s13, %s723_s13   ;;  %s546_s12 = sphi %s584_s12, %s722_s12  }
   0x6   : > { %s609_s18 = sadd.s32 1, %s558_s15   ;;  %s26_s19 = sadd.s32 1, %s554_s14 }
   0x7   : > { %s23_s20 = ssub.s32 %s558_s15, %s609_s18  ;;  %p33_p0 = scmp.ne.s32.totalorder %s554_s14, %s550_s13 }
   0x8   : > { %p24_p1 = scmp.eq.s32.totalorder %s23_s20, 0  ;;  %p34_p2 = scmp.eq.s32.totalorder %s558_s15, 0 }
   0x9   : > { %p39_p3 = scmp.ne.s32.totalorder %s550_s13, %s546_s12  ;;  %p40_p4 = scmp.eq.s32.totalorder %s605_s16, 0 }
   0xa   : > { %s621_s21 = scalar_select %p24_p1, %s554_s14, %s26_s19  }
   0xb   : > { %p35_p5 = por %p34_p2, %p33_p0  ;;  %p623_p6 = por %p40_p4, %p39_p3 }
   0xc   : > { %p105_p7 = scmp.eq.s32.totalorder %s605_s16, 1  ;;  %p111_p8 = scmp.eq.s32.totalorder %s381_s17, 1 }
   0xd   : > { %p383_p9 = scmp.ge.s32.totalorder %s558_s15, 2  ;;  %p424_p10 = scmp.lt.s32.totalorder %s558_s15, 2 }
   0xe   : > { %p630_p11 = por %p105_p7, %p33_p0  ;;  %p634_p12 = por %p111_p8, %p39_p3 }
   0xf   : > { %s137_s25 = sand.u32 1, %s554_s14   ;;  %s408_s26 = smul.u32 48, %s558_s15 }
  0x10   : > { %s407_s27 = smul.u32 48, %s137_s25  ;;  %p643_p13 = pnand %p424_p10, %p35_p5 }
  0x11   : > { %s146_s30 = scalar_lea.hbm %s714_s0, %s408_s26  ;;  %s138_s8 = scalar_lea.sflag [#allocation3], %s137_s25 }
  0x12   : > { %s147_s5 = sshll.u32 %s146_s30, 4  ;;  %s141_s6 = scalar_lea.vmem [#allocation2], %s407_s27  ;;  %s148_s5 = int_to_ptr.hbm [resolvable:$true] %s147_s5 }
  0x13   : > { %s149_s7 = sshll.u32 %s141_s6, 4  ;;  %s462_s9 = sshra.s32 %s148_s5, 4  ;;  %s150_s7 = int_to_ptr.vmem [resolvable:$true] %s149_s7  ;;  %s463_s9 = int_to_ptr.hbm [resolvable:$true] %s462_s9 }
  0x14   : > { %s464_s10 = scalar_lea.hbm %s463_s9, 48  ;;  %p466_p1 = pneg %p643_p13 }
  0x15   : > { %p465_p0 = scmp.ne.s32.totalorder %s463_s9, %s464_s10  ;;  %s469_s19 = scalar_lea.hbm %s714_s0, 96 }
  0x16   : > { %p470_p4 = scmp.lt.s32.totalorder %s463_s9, %s714_s0  ;;  %p471_p5 = scmp.lt.s32.totalorder %s469_s19, %s464_s10 }
  0x17   : > { %p467_p2 = pnand %p466_p1, %p465_p0 }
  0x18   : > { %p472_p7 = por %p471_p5, %p470_p4 }
  0x19   : > { %p468_p3 = pneg %p467_p2 }
  0x1b   : > { %p473_p8 = pnand %p472_p7, %p468_p3 }
  0x1d   : > { %476 = shalt.err (!%p473_p8)
}
  0x1e   : > { %s560_s25 = smov 128   ;;  %s561_s27 = smov 8  }
  0x1f   : > { %419 = dma.hbm_to_vmem [thread:$0]  (!%p643_p13), %s148_s5, 768, %s150_s7, %s138_s8, %s560_s25, %s560_s25, %s561_s27  }
  0x20   : > { %p385_p10 = scmp.ge.s32.totalorder %s558_s15, 1  ;;  %p157_p0 = scmp.lt.s32.totalorder %s558_s15, 3 }
  0x22   : > { %p158_p1 = pnand %p385_p10, %p157_p0 }
  0x23   : > { %s660_s28 = sand.u32 (!%p158_p1), 1, %s550_s13  }
  0x24   : > { %161 = sbr.rel (%p158_p1) target bundleno = 333 (0x14d), region = 32  ;;  %s164_s30 = scalar_lea.sflag (!%p158_p1), [#allocation3], %s660_s28 }
  0x25   : > { %s409_s29 = smul.u32 (!%p158_p1), 48, %s660_s28 }
  0x27   : > { %s167_s6 = scalar_lea.vmem (!%p158_p1), [#allocation2], %s409_s29 }
  0x29   : > { %537 = dma.done.wait (%p623_p6), %s164_s30, 768  }
  0x2a   : > { %539 = vsyncadd (%p623_p6), %s164_s30, 4294966528  ;;  %v198_v0 = vld [vmem:[%s716_s2 + $0x8] sm:$0xff]  ;;  %v197_v1 = vld [vmem:[%s716_s2] sm:$0xff]  ;;  %vm199_vm0 = vcmask 130048   ;;  %vm255_vm1 = vcmask 392192   ;;  %s410_s17 = smul.u32 12, %s660_s28 }
  0x2b   : > { %397 = vmatpush.msra.mxu2 %v198_v0  ;;  %398 = vmatpush.msra.mxu3 %v198_v0  ;;  %v192_v2 = vld [vmem:[%s167_s6 + $0x8] sm:$0xff]  ;;  %v195_v3 = vld [vmem:[%s167_s6 + $0x20] sm:$0xff]  ;;  %v193_v5 = vld [vmem:[%s167_s6 + $0x10] sm:$0xff]  ;;  %s411_s19 = smul.u32 12, %s605_s16  ;;  %vm288_vm2 = vcmask 27648   ;;  %s512_s8 = scalar_lea.hbm %s717_s3, 24 }
  0x2c   : > { %232 = vmatpush.msra.mxu0 %v198_v0  ;;  %v191_v4 = vld [vmem:[%s167_s6] sm:$0xff]  ;;  %v196_v6 = vld [vmem:[%s167_s6 + $0x28] sm:$0xff]  ;;  %v194_v7 = vld [vmem:[%s167_s6 + $0x18] sm:$0xff]  ;;  %s190_s27 = scalar_lea.vmem [#allocation5], %s410_s17  ;;  %s293_s6 = scalar_lea.sflag [#allocation4], %s660_s28 }
  0x2d   : > { %399 = vmatpush.msra.mxu2 %v197_v1  ;;  %400 = vmatpush.msra.mxu3 %v197_v1  ;;  %v253_v14 = vld [vmem:[%s715_s1] sm:$0xff]  ;;  %v254_v15 = vld [vmem:[%s715_s1 + $0x8] sm:$0xf]  ;;  %s304_s25 = scalar_lea.hbm %s717_s3, %s411_s19  ;;  %s305_s29 = sshll.u32 %s190_s27, 4  ;;  %s306_s29 = int_to_ptr.vmem [resolvable:$true] %s305_s29 }
  0x2e   : > { %387 = vmatmul.msk.f32.vlgmr.msra.gmra.mxu2 %vm199_vm0, %v192_v2  ;;  %390 = vmatmul.msk.f32.vlgmr.msra.gmra.mxu3 %vm199_vm0, %v195_v3  ;;  %s307_s30 = sshll.u32 %s304_s25, 4  ;;  %s308_s30 = int_to_ptr.hbm [resolvable:$true] %s307_s30 }
  0x2f   : > { %233 = vmatpush.msra.mxu0 %v197_v1  ;;  %s506_s4 = sshra.s32 %s308_s30, 4  ;;  %s507_s4 = int_to_ptr.hbm [resolvable:$true] %s506_s4 }
  0x30   : > { %386 = vmatmul.msk.f32.vlgmr.msra.gmra.mxu0 %vm199_vm0, %v191_v4  ;;  %s508_s16 = scalar_lea.hbm %s507_s4, 12  ;;  %p513_p3 = scmp.lt.s32.totalorder %s507_s4, %s717_s3 }
  0x31   : > { %p509_p6 = scmp.ne.s32.totalorder %s507_s4, %s508_s16  ;;  %p514_p4 = scmp.lt.s32.totalorder %s512_s8, %s508_s16 }
  0x33   : > { %p510_p13 = pnand %p509_p6, %p630_p11  ;;  %p515_p5 = por %p514_p4, %p513_p3 }
  0x35   : > { %p511_p2 = pneg %p510_p13 }
  0x36   : > { %388 = vmatmul.msk.f32.gmra.mxu2 %vm199_vm0, %v193_v5  ;;  %391 = vmatmul.msk.f32.gmra.mxu3 %vm199_vm0, %v196_v6 }
  0x37   : > { %p516_p7 = pnand %p515_p5, %p511_p2 }
  0x3e   : > { %389 = vmatmul.msk.f32.gmra.mxu2 %vm199_vm0, %v194_v7 }
  0xad   : > { %v235_v13 = vpop.f32.mrf.mxu0 }
  0xb1   : > { %v238_v8 = vpop.f32.mrf.mxu2  ;;  %v247_v9 = vpop.f32.mrf.mxu3 }
  0xb9   : > { %v241_v10 = vpop.f32.mrf.mxu2  ;;  %v250_v11 = vpop.f32.mrf.mxu3 }
  0xba   : > { %272 = vmatpush.msrb.mxu0 %v250_v11  ;;  %401 = vmatpush.msra.mxu1 %v250_v11 }
  0xbc   : > { %273 = vmatpush.msrb.mxu0 %v247_v9  ;;  %402 = vmatpush.msra.mxu1 %v247_v9 }
  0xc1   : > { %v244_v12 = vpop.f32.mrf.mxu2 }
  0xc2   : > { %274 = vmatpush.msrb.mxu0 %v244_v12  ;;  %403 = vmatpush.msra.mxu1 %v244_v12 }
  0xc4   : > { %275 = vmatpush.msrb.mxu0 %v241_v10  ;;  %404 = vmatpush.msra.mxu1 %v241_v10 }
  0xc6   : > { %276 = vmatpush.msrb.mxu0 %v238_v8  ;;  %405 = vmatpush.msra.mxu1 %v238_v8 }
  0xc8   : > { %277 = vmatpush.msrb.mxu0 %v235_v13  ;;  %406 = vmatpush.msra.mxu1 %v235_v13 }
  0xc9   : > { %392 = vmatmul.msk.f32.vlgmr.msrb.gmra.mxu0 %vm255_vm1, %v253_v14  ;;  %393 = vmatmul.msk.f32.vlgmr.msra.gmra.mxu1 %vm255_vm1, %v254_v15 }
 0x146   : > { %v279_v16 = vpop.f32.mrf.mxu0  ;;  %v282_v17 = vpop.f32.mrf.mxu1 }
 0x147   : > { %v286_v18 = vrot.slane %v279_v16, 4  ;;  %289 = vst.msk [vmem:[%s190_s27] sm:$0xf] %vm288_vm2, %v279_v16 }
 0x148   : > { %291 = vst.msk [vmem:[%s190_s27 + $0x8] sm:$0xf] %vm288_vm2, %v282_v17 }
 0x149   : > { %290 = vst.msk [vmem:[%s190_s27 + $0x4] sm:$0xf] %vm288_vm2, %v286_v18 }
 0x14a   : > { %519 = shalt.err (!%p516_p7)
}
 0x14b   : > { %s562_s28 = smov 64   ;;  %s563_s10 = smov 4  }
 0x14c   : > { %414 = dma.vmem_to_hbm [thread:$0]  (%p630_p11), %s306_s29, 192, %s308_s30, %s293_s6, %s562_s28, %s562_s28, %s563_s10  }
 0x14d PF: > { %s322_s11 = sand.u32 1, %s546_s12   ;;  %p421_p8 = pnand %p383_p9, %p634_p12 }
 0x14e   : > { %s323_s17 = scalar_lea.sflag [#allocation4], %s322_s11 }
 0x14f   : > { %p422_p10 = pneg %p421_p8 }
 0x151   : > { %541 = dma.done.wait (%p422_p10), %s323_s17, 192  }
 0x152   : > { %543 = vsyncadd (%p422_p10), %s323_s17, 4294967104  ;;  %p16_p0 = scmp.ge.s32.totalorder %s609_s18, 4   ;;  %s722_s12 = smov %s550_s13 }
 0x153   : > { %s723_s13 = smov %s554_s14  ;;  %s724_s14 = smov %s621_s21 }
 0x154   : > { %s725_s15 = smov %s609_s18  ;;  %18 = sbr.rel (!%p16_p0) target bundleno = 5 (0x5), region = 77 }
 0x159   :  { %329 = vsyncpa [#allocation3], 1 }
 0x15a   :  { %331 = vsyncpa [#allocation3 + $0x1], 1 }
 0x15b   :  { %332 = vsyncpa [#allocation4], 1 }
 0x15c   :  { %334 = vsyncpa [#allocation4 + $0x1], 1 }

</bundles_post_ra>
